<compile_context>
chip_gen: v7x
topology: tpu7x:2x2x1
jax: 0.10.0
libtpu: 0.0.40
codegen_flags: <defaults>
</compile_context>

<pallas_src>
import functools

import numpy as np
import jax
import jax.numpy as jnp
from jax.experimental import pallas as pl
from jax.experimental.pallas import tpu as pltpu


# ----------------------------------------------------------------------------
# Small integer helpers
# ----------------------------------------------------------------------------
def _cdiv(a: int, b: int) -> int:
    return (a + b - 1) // b


def _round_up(a: int, b: int) -> int:
    return _cdiv(a, b) * b


# ----------------------------------------------------------------------------
# Laplacian construction (plain NumPy, mirrors the PyTorch __init__)
# ----------------------------------------------------------------------------
def build_laplacian(nv: int, faces: np.ndarray) -> np.ndarray:
    laplacian = np.zeros([nv, nv], dtype=np.float32)
    laplacian[faces[:, 0], faces[:, 1]] = -1
    laplacian[faces[:, 1], faces[:, 0]] = -1
    laplacian[faces[:, 1], faces[:, 2]] = -1
    laplacian[faces[:, 2], faces[:, 1]] = -1
    laplacian[faces[:, 2], faces[:, 0]] = -1
    laplacian[faces[:, 0], faces[:, 2]] = -1
    r, c = np.diag_indices(laplacian.shape[0])
    laplacian[r, c] = -laplacian.sum(1)
    for i in range(nv):
        laplacian[i, :] /= laplacian[i, i] + 1e-10
    return laplacian


# ----------------------------------------------------------------------------
# Tile selection (build time, pure Python)
#   * tm = lane width of the L^T tile and of the output block (multiple of 128)
#   * tk = contraction tile (sublane dim of L^T tile, lane dim of x^T slab)
#   * guarantee >= 2 row tiles whenever nv allows (v7x megacore sharding)
#   * keep padding waste small by dividing nv as evenly as possible
# ----------------------------------------------------------------------------
def _pick_tiles(nv: int, tm_max: int = 1024, tk_max: int = 4096):
    nv_lane = _round_up(nv, 128)

    # Row (output) axis -> "parallel" grid axis.
    g_m = _cdiv(nv_lane, tm_max)
    if nv_lane >= 2 * 128:
        g_m = max(g_m, 2)            # >=2 tiles so both v7x TCs get work
    tm = _round_up(_cdiv(nv_lane, g_m), 128)
    nv_m = g_m * tm

    # Contraction axis -> "arbitrary" (last) grid axis.
    g_k = _cdiv(nv_lane, tk_max)
    tk = _round_up(_cdiv(nv_lane, g_k), 128)
    nv_k = g_k * tk

    return tm, tk, nv_m, nv_k, g_m, g_k


# ----------------------------------------------------------------------------
# Pallas kernel (transposed, lane-dense dataflow)
#   lt_ref : (tk, tm)  L^T tile        (streamed from HBM, bf16 or f32)
#   xt_ref : (d, tk)   x^T slab        (tiny)
#   o_ref  : (1, tm)   output block    (f32, lane-dense unmasked stores)
#   acc_ref: (d, tm)   f32 accumulator (VMEM scratch, persists over K)
# ----------------------------------------------------------------------------
def _lap_loss_kernel(lt_ref, xt_ref, o_ref, acc_ref):
    k = pl.program_id(1)

    @pl.when(k == 0)
    def _():
        acc_ref[...] = jnp.zeros_like(acc_ref)

    acc_ref[...] += jnp.dot(
        xt_ref[...],
        lt_ref[...],
        preferred_element_type=jnp.float32,
        precision=jax.lax.Precision.HIGHEST,
    )

    @pl.when(k == pl.num_programs(1) - 1)
    def _():
        y = acc_ref[...]
        o_ref[...] = jnp.sum(y * y, axis=0, keepdims=True)


# ----------------------------------------------------------------------------
# Traced forward: only x is padded/transposed per call (tiny); L^T is prebuilt.
# ----------------------------------------------------------------------------
def _forward(lap_t, x, *, nv, tm, tk, nv_m, nv_k, vmem_limit_bytes):
    d = x.shape[1]

    x_t = jnp.zeros((d, nv_k), lap_t.dtype).at[:, :nv].set(x.T.astype(lap_t.dtype))

    g_m = nv_m // tm
    g_k = nv_k // tk
    l_bytes = jnp.dtype(lap_t.dtype).itemsize

    cost = pl.CostEstimate(
        flops=2 * nv_m * nv_k * d + 3 * nv_m * d,
        transcendentals=0,
        bytes_accessed=(
            l_bytes * nv_m * nv_k            # L^T streamed once
            + g_m * l_bytes * nv_k * d       # x^T re-read once per row tile
            + 4 * nv_m                       # output
        ),
    )

    out2d = pl.pallas_call(
        _lap_loss_kernel,
        out_shape=jax.ShapeDtypeStruct((1, nv_m), jnp.float32),
        grid_spec=pltpu.PrefetchScalarGridSpec(
            num_scalar_prefetch=0,
            grid=(g_m, g_k),
            in_specs=[
                pl.BlockSpec((tk, tm), lambda i, k: (k, i)),   # L^T tile
                pl.BlockSpec((d, tk), lambda i, k: (0, k)),    # x^T slab
            ],
            # Same output block across K -> accumulator-resident, written once.
            out_specs=pl.BlockSpec((1, tm), lambda i, k: (0, i)),
            scratch_shapes=[pltpu.VMEM((d, tm), jnp.float32)],
        ),
        compiler_params=pltpu.CompilerParams(
            dimension_semantics=("parallel", "arbitrary"),
            vmem_limit_bytes=vmem_limit_bytes,
        ),
        cost_estimate=cost,
    )(lap_t, x_t)

    return out2d[0, :nv]


# ----------------------------------------------------------------------------
# Module-like wrapper (mirrors the PyTorch LaplacianLoss interface)
# ----------------------------------------------------------------------------
class LaplacianLoss:
    def __init__(self, vertices, faces, average=False, *,
                 l_dtype=jnp.bfloat16, tm_max=1024, tk_max=4096,
                 vmem_limit_bytes=48 * 1024 * 1024):
        nv = int(np.asarray(vertices).shape[0])
        faces = np.asarray(faces)
        self.nv = nv
        self.nf = int(faces.shape[0])
        self.average = average  # unused in forward (matches the original module)

        lap = build_laplacian(nv, faces)

        tm, tk, nv_m, nv_k, _, _ = _pick_tiles(nv, tm_max, tk_max)
        self.tm, self.tk, self.nv_m, self.nv_k = tm, tk, nv_m, nv_k

        # Pre-pad, pre-transpose and cast ONCE at build time.  Padded rows/cols
        # of L^T and padded rows of x contribute exactly zero, so the forward
        # math is unchanged and the traced forward never touches an nv x nv pad.
        lap_t = np.zeros((nv_k, nv_m), np.float32)
        lap_t[:nv, :nv] = lap.T
        self.laplacian_t = jnp.asarray(lap_t, dtype=l_dtype)

        self._fwd = jax.jit(functools.partial(
            _forward, nv=nv, tm=tm, tk=tk, nv_m=nv_m, nv_k=nv_k,
            vmem_limit_bytes=vmem_limit_bytes))

    def __call__(self, x):
        """x: [nv, 3] -> [nv] rowwise ||L x||^2 (float32)."""
        return self._fwd(self.laplacian_t, x)


# ----------------------------------------------------------------------------
# Demo / self-check
# ----------------------------------------------------------------------------
if __name__ == "__main__":
    key = jax.random.PRNGKey(0)
    ok = True

    # Case 1: tile-aligned small mesh, f32 Laplacian (exact semantics).
    # Case 2: nv not a multiple of 128, bf16 Laplacian (build-time padding path
    #         + multiple row tiles).
    for nv, nf, l_dtype in ((64, 96, jnp.float32), (200, 300, jnp.bfloat16)):
        faces = np.stack(
            [np.arange(nf) % nv, (np.arange(nf) + 1) % nv, (np.arange(nf) + 2) % nv],
            axis=1,
        ).astype(np.int64)
        verts = np.zeros((nv, 3), dtype=np.float32)

        loss_mod = LaplacianLoss(verts, faces, l_dtype=l_dtype)

        key, sub = jax.random.split(key)
        x = jax.random.normal(sub, (nv, 3), dtype=jnp.float32)

        out = jax.block_until_ready(loss_mod(x))

        # Host reference (float64) using the exact operands the kernel consumed
        # (quantized L^T buffer and quantized x), so only accumulation order
        # differs.
        lq = np.asarray(loss_mod.laplacian_t.astype(jnp.float32)).astype(np.float64)
        L_q = lq[:nv, :nv].T
        x_q = np.asarray(x.astype(l_dtype).astype(jnp.float32)).astype(np.float64)
        ref = ((L_q @ x_q) ** 2).sum(axis=1)

        if out.shape != (nv,) or out.dtype != jnp.float32:
            ok = False
        try:
            np.testing.assert_allclose(np.asarray(out), ref, rtol=1e-4, atol=1e-4)
        except AssertionError:
            ok = False

    if ok:
        print("KERNEL_OK")
</pallas_src>

<mosaic_0001>
module attributes {stable_mosaic.version = 11 : i64} {
  func.func @_lap_loss_kernel(%arg0: i32, %arg1: i32, %arg2: memref<128x128xf32, #tpu.memory_space<vmem>>, %arg3: memref<3x128xf32, #tpu.memory_space<vmem>>, %arg4: memref<1x128xf32, #tpu.memory_space<vmem>>, %arg5: memref<3x128xf32, #tpu.memory_space<vmem>>) attributes {dimension_semantics = [#tpu.dimension_semantics<parallel>, #tpu.dimension_semantics<arbitrary>], iteration_bounds = array<i64: 1, 1>, scalar_prefetch = 0 : i64, scratch_operands = 1 : i64, tpu.core_type = #tpu.core_type<tc>, window_params = [{transform_indices = @transform_0, window_bounds = array<i64: 128, 128>}, {transform_indices = @transform_1, window_bounds = array<i64: 3, 128>}, {transform_indices = @transform_2, window_bounds = array<i64: 1, 128>}]} {
    %c0_i32 = arith.constant 0 : i32
    %0 = arith.cmpi eq, %arg1, %c0_i32 : i32
    %1 = arith.extui %0 : i1 to i32
    %c0_i32_0 = arith.constant 0 : i32
    %2 = arith.cmpi ne, %1, %c0_i32_0 : i32
    scf.if %2 {
      %cst_10 = arith.constant 0.000000e+00 : f32
      %12 = vector.broadcast %cst_10 : f32 to vector<3x128xf32>
      %c0_11 = arith.constant 0 : index
      %c0_12 = arith.constant 0 : index
      %13 = vector.load %arg5[%c0_11, %c0_12] : memref<3x128xf32, #tpu.memory_space<vmem>>, vector<3x128xf32>
      tpu.vector_store %arg5[%c0_11, %c0_12], %12 {strides = array<i32>} : memref<3x128xf32, #tpu.memory_space<vmem>>, vector<3x128xf32>,
    } else {
    }
    %c0 = arith.constant 0 : index
    %c0_1 = arith.constant 0 : index
    %3 = vector.load %arg5[%c0, %c0_1] : memref<3x128xf32, #tpu.memory_space<vmem>>, vector<3x128xf32>
    %c0_2 = arith.constant 0 : index
    %c0_3 = arith.constant 0 : index
    %4 = vector.load %arg3[%c0_2, %c0_3] : memref<3x128xf32, #tpu.memory_space<vmem>>, vector<3x128xf32>
    %c0_4 = arith.constant 0 : index
    %c0_5 = arith.constant 0 : index
    %5 = vector.load %arg2[%c0_4, %c0_5] : memref<128x128xf32, #tpu.memory_space<vmem>>, vector<128x128xf32>
    %cst = arith.constant dense<0.000000e+00> : vector<3x128xf32>
    %6 = tpu.matmul %4, %5, %cst {dimension_numbers = #tpu.dot_dimension_numbers<[1], [0], [0], [1], [0, 0, 1, 1], [], []>, precision = #tpu.contract_precision<fp32>} : vector<3x128xf32>, vector<128x128xf32>, vector<3x128xf32> -> vector<3x128xf32>
    %7 = arith.addf %3, %6 : vector<3x128xf32>
    %c0_6 = arith.constant 0 : index
    %c0_7 = arith.constant 0 : index
    %8 = vector.load %arg5[%c0_6, %c0_7] : memref<3x128xf32, #tpu.memory_space<vmem>>, vector<3x128xf32>
    tpu.vector_store %arg5[%c0_6, %c0_7], %7 {strides = array<i32>} : memref<3x128xf32, #tpu.memory_space<vmem>>, vector<3x128xf32>,
    %c0_i32_8 = arith.constant 0 : i32
    %9 = arith.cmpi eq, %arg1, %c0_i32_8 : i32
    %10 = arith.extui %9 : i1 to i32
    %c0_i32_9 = arith.constant 0 : i32
    %11 = arith.cmpi ne, %10, %c0_i32_9 : i32
    scf.if %11 {
      %c0_10 = arith.constant 0 : index
      %c0_11 = arith.constant 0 : index
      %12 = vector.load %arg5[%c0_10, %c0_11] : memref<3x128xf32, #tpu.memory_space<vmem>>, vector<3x128xf32>
      %13 = arith.mulf %12, %12 : vector<3x128xf32>
      %cst_12 = arith.constant dense<0.000000e+00> : vector<128xf32>
      %14 = vector.multi_reduction <add>, %13, %cst_12 [0] : vector<3x128xf32> to vector<128xf32>
      %15 = vector.shape_cast %14 : vector<128xf32> to vector<1x128xf32>
      %c0_13 = arith.constant 0 : index
      %c0_14 = arith.constant 0 : index
      %16 = vector.load %arg4[%c0_13, %c0_14] : memref<1x128xf32, #tpu.memory_space<vmem>>, vector<1x128xf32>
      tpu.vector_store %arg4[%c0_13, %c0_14], %15 {strides = array<i32>} : memref<1x128xf32, #tpu.memory_space<vmem>>, vector<1x128xf32>,
    } else {
    }
    return
  }
  func.func @transform_0(%arg0: i32, %arg1: i32) -> (i32, i32) {
    %c0_i32 = arith.constant 0 : i32
    return %arg1, %arg0 : i32, i32
  }
  func.func @transform_1(%arg0: i32, %arg1: i32) -> (i32, i32) {
    %c0_i32 = arith.constant 0 : i32
    %c0_i32_0 = arith.constant 0 : i32
    return %c0_i32, %arg1 : i32, i32
  }
  func.func @transform_2(%arg0: i32, %arg1: i32) -> (i32, i32) {
    %c0_i32 = arith.constant 0 : i32
    %c0_i32_0 = arith.constant 0 : i32
    return %c0_i32, %arg0 : i32, i32
  }
}

</mosaic_0001>

<bundles_post_ra>
// kernel: _forward.1
= control target key start
LH: loop header
LB: loop body
LE: loop exit
PB: predicated region body
PF: predicated region fallthrough
CT: control target
= control target key end

     0   :  { %7 = vsyncpa [#allocation4], 0  ;;  %s1196_s9 = smov [#allocation3]   ;;  %s1495_s0 = inlined_call_operand.hbm [shape: f32[128,128], index: 0, kind: input, shape index: {}]   ;;  %s1496_s1 = inlined_call_operand.vmem [shape: f32[3,128], index: 1, kind: input, shape index: {}]   ;;  %s1497_s2 = inlined_call_operand.vmem [shape: f32[1,128], index: 2, kind: output, shape index: {}]  }
   0x1   :  { %s13_s10 = sshll.u32 %s1196_s9, 4  ;;  %s1172_s13 = scalar_lea.hbm %s1495_s0, 2048  ;;  %s14_s10 = int_to_ptr.vmem [resolvable:$true] %s13_s10 }
   0x2   :  { %p1173_p0 = scmp.ne.s32.totalorder %s1495_s0, %s1172_s13  ;;  %p1176_p1 = scmp.lt.u32.totalorder %s1172_s13, %s1495_s0 }
   0x4   :  { %p1178_p2 = pnand %p1176_p1, %p1173_p0 }
   0x6   :  { %1181 = shalt.err (!%p1178_p2)
}
   0x7   :  { %s1182_s18 = scalar_lea.vmem %s14_s10, 2048  ;;  %p1187_p4 = scmp.lt.s32.totalorder %s14_s10, %s14_s10 }
   0x8   :  { %p1183_p3 = scmp.ne.s32.totalorder %s14_s10, %s1182_s18  ;;  %p1188_p5 = scmp.lt.s32.totalorder %s1182_s18, %s1182_s18 }
   0xa   :  { %p1189_p6 = por %p1188_p5, %p1187_p4 }
   0xc   :  { %p1190_p7 = pnand %p1189_p6, %p1183_p3 }
   0xe   :  { %1193 = shalt.err (!%p1190_p7)
}
   0xf   :  { %s1197_s19 = smov 128   ;;  %s1198_s20 = smov 8  }
  0x10   :  { %19 = dma.hbm_to_vmem [thread:$0]  %s1495_s0, 2048, %s14_s10, [#allocation4], %s1197_s19, %s1197_s19, %s1198_s20  }
  0x11   :  { %1194 = dma.done.wait [#allocation4], 2048  }
  0x12   :  { %1195 = vsyncadd [#allocation4], 4294965248  ;;  %v1199_v0 = vmov 0.0|0.0   ;;  %v1200_v1 = vmov 0.0   ;;  %vm1201_vm0 = vmmov 0   ;;  %v32_v2 = vld [vmem:[#allocation3] sm:$0xff] }
  0x13   :  { %1022 = vmatprep.subr.bf16.mxu0 %v1199_v0  ;;  %1046 = vmatprep.subr.bf16.mxu1 %v1199_v0  ;;  %29 = vst [vmem:[#allocation2] sm:$0x7] %v1200_v1  ;;  %v33_v3 = vld [vmem:[#allocation3 + $0x8] sm:$0xff]  ;;  %v34_v4 = vld [vmem:[#allocation3 + $0x10] sm:$0xff]  ;;  %v49_v5 = vand.u32 4294901760, %v32_v2  ;;  %v35_v7 = vld [vmem:[#allocation3 + $0x18] sm:$0xff] }
  0x14   :  { %844 = vmatprep.mubr.msk.f32.mxu0 %vm1201_vm0, %v1200_v1  ;;  %879 = vmatprep.mubr.msk.f32.mxu1 %vm1201_vm0, %v1200_v1  ;;  %v52_v6 = vand.u32 4294901760, %v33_v3  ;;  %v55_v8 = vand.u32 4294901760, %v34_v4  ;;  %v36_v9 = vld [vmem:[#allocation3 + $0x20] sm:$0xff]  ;;  %v37_v10 = vld [vmem:[#allocation3 + $0x28] sm:$0xff]  ;;  %v58_v11 = vand.u32 4294901760, %v35_v7  ;;  %v38_v14 = vld [vmem:[#allocation3 + $0x30] sm:$0xff] }
  0x15   :  { %v61_v12 = vand.u32 4294901760, %v36_v9  ;;  %v64_v13 = vand.u32 4294901760, %v37_v10  ;;  %v1238_v16 = vsub.f32 %v32_v2, %v49_v5  ;;  %v39_v19 = vld [vmem:[#allocation3 + $0x38] sm:$0xff]  ;;  %v40_v20 = vld [vmem:[#allocation3 + $0x40] sm:$0xff]  ;;  %v67_v26 = vand.u32 4294901760, %v38_v14  ;;  %v41_v27 = vld [vmem:[#allocation3 + $0x48] sm:$0xff] }
  0x16   :  { %v1236_v15 = vpack.c.bf16 %v52_v6, %v49_v5  ;;  %v1240_v17 = vsub.f32 %v33_v3, %v52_v6  ;;  %v1242_v18 = vsub.f32 %v34_v4, %v55_v8  ;;  %v1244_v21 = vpack.c.bf16 %v58_v11, %v55_v8  ;;  %v42_v40 = vld [vmem:[#allocation3 + $0x50] sm:$0xff]  ;;  %v43_v41 = vld [vmem:[#allocation3 + $0x58] sm:$0xff]  ;;  %v44_v50 = vld [vmem:[#allocation3 + $0x60] sm:$0xff] }
  0x17   :  { %v1246_v22 = vsub.f32 %v35_v7, %v58_v11  ;;  %v1249_v23 = vsub.f32 %v36_v9, %v61_v12  ;;  %v142_v24 = vand.u32 4294901760, %v1238_v16  ;;  %v70_v28 = vand.u32 4294901760, %v39_v19  ;;  %v45_v59 = vld [vmem:[#allocation3 + $0x68] sm:$0xff]  ;;  %v46_v2 = vld [vmem:[#allocation3 + $0x70] sm:$0xff]  ;;  %v47_v7 = vld [vmem:[#allocation3 + $0x78] sm:$0xff] }
  0x18   :  { %1024 = vmatpush3.bf16.msra.mxu0 %v1236_v15  ;;  %v149_v25 = vand.u32 4294901760, %v1240_v17  ;;  %v156_v29 = vand.u32 4294901760, %v1242_v18  ;;  %v73_v31 = vand.u32 4294901760, %v40_v20  ;;  %v1256_v32 = vsub.f32 %v37_v10, %v64_v13 }
  0x19   :  { %1025 = vmatprep.subr.bf16.mxu0 %v1199_v0  ;;  %v163_v30 = vand.u32 4294901760, %v1246_v22  ;;  %v143_v33 = vsub.f32 %v1238_v16, %v142_v24  ;;  %v1264_v35 = vsub.f32 %v38_v14, %v67_v26  ;;  %v1266_v36 = vsub.f32 %v39_v19, %v70_v28 }
  0x1a   :  { %v150_v34 = vsub.f32 %v1240_v17, %v149_v25  ;;  %v157_v37 = vsub.f32 %v1242_v18, %v156_v29  ;;  %v76_v39 = vand.u32 4294901760, %v41_v27  ;;  %v1275_v42 = vpack.c.bf16 %v64_v13, %v61_v12 }
  0x1b   :  { %v164_v38 = vsub.f32 %v1246_v22, %v163_v30  ;;  %v144_v43 = vand.u32 4294901760, %v143_v33  ;;  %v1277_v45 = vpack.c.bf16 %v70_v28, %v67_v26  ;;  %v1280_v48 = vsub.f32 %v40_v20, %v73_v31 }
  0x1c   :  { %1027 = vmatpush3.bf16.msra.mxu0 %v1244_v21  ;;  %v151_v44 = vand.u32 4294901760, %v150_v34  ;;  %v158_v46 = vand.u32 4294901760, %v157_v37  ;;  %v170_v49 = vand.u32 4294901760, %v1249_v23  ;;  %v177_v52 = vand.u32 4294901760, %v1256_v32 }
  0x1d   :  { %1028 = vmatprep.subr.bf16.mxu0 %v1199_v0  ;;  %v165_v47 = vand.u32 4294901760, %v164_v38  ;;  %v79_v53 = vand.u32 4294901760, %v42_v40  ;;  %v82_v54 = vand.u32 4294901760, %v43_v41  ;;  %v1284_v55 = vsub.f32 %v41_v27, %v76_v39 }
  0x1e   :  { %v1047_v51 = vpack.c.bf16 %v151_v44, %v144_v43  ;;  %v171_v56 = vsub.f32 %v1249_v23, %v170_v49  ;;  %v184_v57 = vand.u32 4294901760, %v1264_v35  ;;  %v191_v58 = vand.u32 4294901760, %v1266_v36 }
  0x1f   :  { %v1050_v60 = vpack.c.bf16 %v165_v47, %v158_v46  ;;  %v1292_v61 = vpack.c.bf16 %v76_v39, %v73_v31  ;;  %v178_v62 = vsub.f32 %v1256_v32, %v177_v52  ;;  %v85_v63 = vand.u32 4294901760, %v44_v50  ;;  %v31_v31 = vld [vmem:[%s1496_s1] sm:$0x7] }
  0x20   :  { %1030 = vmatpush3.bf16.msra.mxu0 %v1275_v42  ;;  %1048 = vmatpush3.bf16.msra.mxu1 %v1047_v51  ;;  %v172_v3 = vand.u32 4294901760, %v171_v56  ;;  %v1299_v4 = vsub.f32 %v42_v40, %v79_v53  ;;  %v185_v5 = vsub.f32 %v1264_v35, %v184_v57  ;;  %v192_v6 = vsub.f32 %v1266_v36, %v191_v58 }
  0x21   :  { %1031 = vmatprep.subr.bf16.mxu0 %v1199_v0  ;;  %1049 = vmatprep.subr.bf16.mxu1 %v1199_v0  ;;  %v179_v8 = vand.u32 4294901760, %v178_v62  ;;  %v1307_v9 = vsub.f32 %v43_v41, %v82_v54  ;;  %v88_v10 = vand.u32 4294901760, %v45_v59  ;;  %v198_v11 = vand.u32 4294901760, %v1280_v48 }
  0x22   :  { %v186_v12 = vand.u32 4294901760, %v185_v5  ;;  %v193_v13 = vand.u32 4294901760, %v192_v6  ;;  %v205_v14 = vand.u32 4294901760, %v1284_v55  ;;  %v91_v19 = vand.u32 4294901760, %v46_v2 }
  0x23   :  { %v1053_v20 = vpack.c.bf16 %v179_v8, %v172_v3  ;;  %v1312_v26 = vsub.f32 %v44_v50, %v85_v63  ;;  %v1314_v27 = vsub.f32 %v45_v59, %v88_v10  ;;  %v94_v28 = vand.u32 4294901760, %v47_v7 }
  0x24   :  { %1033 = vmatpush3.bf16.msra.mxu0 %v1277_v45  ;;  %1051 = vmatpush3.bf16.msra.mxu1 %v1050_v60  ;;  %v199_v33 = vsub.f32 %v1280_v48, %v198_v11  ;;  %v206_v34 = vsub.f32 %v1284_v55, %v205_v14  ;;  %v212_v37 = vand.u32 4294901760, %v1299_v4  ;;  %v1328_v38 = vpack.c.bf16 %v82_v54, %v79_v53 }
  0x25   :  { %1034 = vmatprep.subr.bf16.mxu0 %v1199_v0  ;;  %1052 = vmatprep.subr.bf16.mxu1 %v1199_v0  ;;  %v1056_v39 = vpack.c.bf16 %v193_v13, %v186_v12  ;;  %v1330_v40 = vsub.f32 %v46_v2, %v91_v19  ;;  %v219_v41 = vand.u32 4294901760, %v1307_v9  ;;  %v1336_v47 = vand.u32 4294901760, %v31_v31 }
  0x26   :  { %v200_v43 = vand.u32 4294901760, %v199_v33  ;;  %v207_v44 = vand.u32 4294901760, %v206_v34  ;;  %v213_v46 = vsub.f32 %v1299_v4, %v212_v37  ;;  %v1339_v50 = vsub.f32 %v47_v7, %v94_v28 }
  0x27   :  { %v220_v51 = vsub.f32 %v1307_v9, %v219_v41  ;;  %v226_v53 = vand.u32 4294901760, %v1312_v26  ;;  %v233_v54 = vand.u32 4294901760, %v1314_v27  ;;  %v1349_v56 = vsub.f32 %v31_v31, %v1336_v47 }
  0x28   :  { %1036 = vmatpush3.bf16.msra.mxu0 %v1292_v61  ;;  %1054 = vmatpush3.bf16.msra.mxu1 %v1053_v20  ;;  %v1351_v59 = vpack.c.bf16 %v88_v10, %v85_v63  ;;  %v1059_v60 = vpack.c.bf16 %v207_v44, %v200_v43  ;;  %v214_v62 = vand.u32 4294901760, %v213_v46  ;;  %v240_v3 = vand.u32 4294901760, %v1330_v40 }
  0x29   :  { %1037 = vmatprep.subr.bf16.mxu0 %v1199_v0  ;;  %1055 = vmatprep.subr.bf16.mxu1 %v1199_v0  ;;  %v131_v2 = vand.u32 4294901760, %v1349_v56  ;;  %v221_v5 = vand.u32 4294901760, %v220_v51  ;;  %v227_v6 = vsub.f32 %v1312_v26, %v226_v53  ;;  %v234_v7 = vsub.f32 %v1314_v27, %v233_v54 }
  0x2a   :  { %v247_v63 = vand.u32 4294901760, %v1339_v50  ;;  %v1365_v8 = vpack.c.bf16 %v94_v28, %v91_v19  ;;  %v241_v12 = vsub.f32 %v1330_v40, %v240_v3  ;;  %v1071_v34 = vpack.c.bf16 %v1240_v17, %v1238_v16 }
  0x2b   :  { %v132_v10 = vsub.f32 %v1349_v56, %v131_v2  ;;  %v1062_v13 = vpack.c.bf16 %v221_v5, %v214_v62  ;;  %v228_v20 = vand.u32 4294901760, %v227_v6  ;;  %v235_v31 = vand.u32 4294901760, %v234_v7 }
  0x2c   :  { %1039 = vmatpush3.bf16.msra.mxu0 %v1328_v38  ;;  %1057 = vmatpush3.bf16.msra.mxu1 %v1056_v39  ;;  %v248_v33 = vsub.f32 %v1339_v50, %v247_v63  ;;  %v242_v39 = vand.u32 4294901760, %v241_v12  ;;  %v1074_v46 = vpack.c.bf16 %v1246_v22, %v1242_v18  ;;  %v1077_v51 = vpack.c.bf16 %v1256_v32, %v1249_v23 }
  0x2d   :  { %1040 = vmatprep.subr.bf16.mxu0 %v1199_v0  ;;  %1058 = vmatprep.subr.bf16.mxu1 %v1199_v0  ;;  %v133_v19 = vand.u32 4294901760, %v132_v10  ;;  %v1065_v28 = vpack.c.bf16 %v235_v31, %v228_v20  ;;  %v1083_v62 = vpack.c.bf16 %v1284_v55, %v1280_v48  ;;  %v1086_v5 = vpack.c.bf16 %v1307_v9, %v1299_v4  ;;  %v30_v55 = vld [vmem:[#allocation2] sm:$0x7] }
  0x2e   :  { %v249_v43 = vand.u32 4294901760, %v248_v33  ;;  %v1089_v6 = vpack.c.bf16 %v1314_v27, %v1312_v26  ;;  %v1092_v7 = vpack.c.bf16 %v1339_v50, %v1330_v40  ;;  %v1119_v10 = vpack.c.bf16 %v149_v25, %v142_v24 }
  0x2f   :  { %v1122_v12 = vpack.c.bf16 %v163_v30, %v156_v29  ;;  %v1125_v16 = vpack.c.bf16 %v177_v52, %v170_v49  ;;  %v1128_v17 = vpack.c.bf16 %v191_v58, %v184_v57  ;;  %v1137_v18 = vpack.c.bf16 %v233_v54, %v226_v53 }
  0x30   :  { %1042 = vmatpush3.bf16.msra.mxu0 %v1351_v59  ;;  %1060 = vmatpush3.bf16.msra.mxu1 %v1059_v60  ;;  %v1068_v44 = vpack.c.bf16 %v249_v43, %v242_v39  ;;  %v1080_v60 = vpack.c.bf16 %v1266_v36, %v1264_v35  ;;  %vm696_vm1 = vcmask 1042432  }
  0x31   :  { %1043 = vmatprep.subr.bf16.mxu0 %v1199_v0  ;;  %1061 = vmatprep.subr.bf16.mxu1 %v1199_v0 }
  0x34   :  { %1045 = vmatpush3.bf16.msra.mxu0 %v1365_v8  ;;  %1063 = vmatpush3.bf16.msra.mxu1 %v1062_v13 }
  0x35   :  { %1064 = vmatprep.subr.bf16.mxu1 %v1199_v0  ;;  %1070 = vmatprep.subr.bf16.mxu0 %v1199_v0 }
  0x37   :  { %845 = vmatmul.mubr.f32.vlgmr.msra.gmra.mrb[0].mxu0 %v133_v19 }
  0x38   :  { %1066 = vmatpush3.bf16.msra.mxu1 %v1065_v28  ;;  %1072 = vmatpush3.bf16.msra.mxu0 %v1071_v34 }
  0x39   :  { %1067 = vmatprep.subr.bf16.mxu1 %v1199_v0  ;;  %1073 = vmatprep.subr.bf16.mxu0 %v1199_v0 }
  0x3a   :  { %914 = vmatprep.mubr.msk.f32.mxu0 %vm1201_vm0, %v1200_v1 }
  0x3c   :  { %1069 = vmatpush3.bf16.msra.mxu1 %v1068_v44  ;;  %1075 = vmatpush3.bf16.msra.mxu0 %v1074_v46 }
  0x3d   :  { %1076 = vmatprep.subr.bf16.mxu0 %v1199_v0  ;;  %1094 = vmatprep.subr.bf16.mxu1 %v1199_v0 }
  0x3f   :  { %880 = vmatmul.mubr.f32.vlgmr.msra.gmra.mrb[0].mxu1 %v1336_v47 }
  0x40   :  { %1078 = vmatpush3.bf16.msra.mxu0 %v1077_v51  ;;  %1096 = vmatpush3.bf16.msra.mxu1 %v1236_v15 }
  0x41   :  { %1079 = vmatprep.subr.bf16.mxu0 %v1199_v0  ;;  %1097 = vmatprep.subr.bf16.mxu1 %v1199_v0 }
  0x42   :  { %949 = vmatprep.mubr.msk.f32.mxu1 %vm1201_vm0, %v1200_v1 }
  0x44   :  { %1081 = vmatpush3.bf16.msra.mxu0 %v1080_v60  ;;  %1099 = vmatpush3.bf16.msra.mxu1 %v1244_v21 }
  0x45   :  { %1082 = vmatprep.subr.bf16.mxu0 %v1199_v0  ;;  %1100 = vmatprep.subr.bf16.mxu1 %v1199_v0 }
  0x48   :  { %1084 = vmatpush3.bf16.msra.mxu0 %v1083_v62  ;;  %1102 = vmatpush3.bf16.msra.mxu1 %v1275_v42 }
  0x49   :  { %1085 = vmatprep.subr.bf16.mxu0 %v1199_v0  ;;  %1103 = vmatprep.subr.bf16.mxu1 %v1199_v0 }
  0x4c   :  { %1087 = vmatpush3.bf16.msra.mxu0 %v1086_v5  ;;  %1105 = vmatpush3.bf16.msra.mxu1 %v1277_v45 }
  0x4d   :  { %1088 = vmatprep.subr.bf16.mxu0 %v1199_v0  ;;  %1106 = vmatprep.subr.bf16.mxu1 %v1199_v0 }
  0x50   :  { %1090 = vmatpush3.bf16.msra.mxu0 %v1089_v6  ;;  %1108 = vmatpush3.bf16.msra.mxu1 %v1292_v61 }
  0x51   :  { %1091 = vmatprep.subr.bf16.mxu0 %v1199_v0  ;;  %1109 = vmatprep.subr.bf16.mxu1 %v1199_v0 }
  0x54   :  { %1093 = vmatpush3.bf16.msra.mxu0 %v1092_v7  ;;  %1111 = vmatpush3.bf16.msra.mxu1 %v1328_v38 }
  0x55   :  { %1112 = vmatprep.subr.bf16.mxu1 %v1199_v0  ;;  %1118 = vmatprep.subr.bf16.mxu0 %v1199_v0 }
  0x57   :  { %915 = vmatmul.mubr.f32.vlgmr.msra.gmra.mrb[2].mxu0 %v1349_v56 }
  0x58   :  { %1114 = vmatpush3.bf16.msra.mxu1 %v1351_v59  ;;  %1120 = vmatpush3.bf16.msra.mxu0 %v1119_v10 }
  0x59   :  { %1115 = vmatprep.subr.bf16.mxu1 %v1199_v0  ;;  %1121 = vmatprep.subr.bf16.mxu0 %v1199_v0 }
  0x5a   :  { %984 = vmatprep.mubr.msk.f32.mxu0 %vm1201_vm0, %v1200_v1 }
  0x5c   :  { %1117 = vmatpush3.bf16.msra.mxu1 %v1365_v8  ;;  %1123 = vmatpush3.bf16.msra.mxu0 %v1122_v12 }
  0x5d   :  { %1124 = vmatprep.subr.bf16.mxu0 %v1199_v0  ;;  %1142 = vmatprep.subr.bf16.mxu1 %v1199_v0 }
  0x5f   :  { %950 = vmatmul.mubr.f32.vlgmr.msra.gmra.mrb[2].mxu1 %v131_v2 }
  0x60   :  { %1126 = vmatpush3.bf16.msra.mxu0 %v1125_v16  ;;  %1144 = vmatpush3.bf16.msra.mxu1 %v1236_v15  ;;  %v1131_v15 = vpack.c.bf16 %v205_v14, %v198_v11 }
  0x61   :  { %1127 = vmatprep.subr.bf16.mxu0 %v1199_v0  ;;  %1145 = vmatprep.subr.bf16.mxu1 %v1199_v0 }
  0x62   :  { %1019 = vmatprep.mubr.msk.f32.mxu1 %vm1201_vm0, %v1200_v1  ;;  %v1134_v1 = vpack.c.bf16 %v219_v41, %v212_v37 }
  0x64   :  { %1129 = vmatpush3.bf16.msra.mxu0 %v1128_v17  ;;  %1147 = vmatpush3.bf16.msra.mxu1 %v1244_v21  ;;  %v1140_v21 = vpack.c.bf16 %v247_v63, %v240_v3 }
  0x65   :  { %1130 = vmatprep.subr.bf16.mxu0 %v1199_v0  ;;  %1148 = vmatprep.subr.bf16.mxu1 %v1199_v0 }
  0x68   :  { %1132 = vmatpush3.bf16.msra.mxu0 %v1131_v15  ;;  %1150 = vmatpush3.bf16.msra.mxu1 %v1275_v42 }
  0x69   :  { %1133 = vmatprep.subr.bf16.mxu0 %v1199_v0  ;;  %1151 = vmatprep.subr.bf16.mxu1 %v1199_v0 }
  0x6c   :  { %1135 = vmatpush3.bf16.msra.mxu0 %v1134_v1  ;;  %1153 = vmatpush3.bf16.msra.mxu1 %v1277_v45 }
  0x6d   :  { %1136 = vmatprep.subr.bf16.mxu0 %v1199_v0  ;;  %1154 = vmatprep.subr.bf16.mxu1 %v1199_v0 }
  0x70   :  { %1138 = vmatpush3.bf16.msra.mxu0 %v1137_v18  ;;  %1156 = vmatpush3.bf16.msra.mxu1 %v1292_v61 }
  0x71   :  { %1139 = vmatprep.subr.bf16.mxu0 %v1199_v0  ;;  %1157 = vmatprep.subr.bf16.mxu1 %v1199_v0 }
  0x74   :  { %1141 = vmatpush3.bf16.msra.mxu0 %v1140_v21  ;;  %1159 = vmatpush3.bf16.msra.mxu1 %v1328_v38 }
  0x75   :  { %1160 = vmatprep.subr.bf16.mxu1 %v1199_v0 }
  0x77   :  { %985 = vmatmul.mubr.f32.vlgmr.msra.gmra.mrb[4].mxu0 %v1336_v47 }
  0x78   :  { %1162 = vmatpush3.bf16.msra.mxu1 %v1351_v59 }
  0x79   :  { %1163 = vmatprep.subr.bf16.mxu1 %v1199_v0 }
  0x7c   :  { %1165 = vmatpush3.bf16.msra.mxu1 %v1365_v8 }
  0x7f   :  { %1020 = vmatmul.mubr.f32.vlgmr.msra.gmra.mrb[4].mxu1 %v1336_v47 }
 0x10a   :  { %v135_v22 = vpop.f32.mrb[0].mxu0 }
 0x10b   :  { %v846_v23 = vpop.f32.mrb[1].mxu0 }
 0x112   :  { %v286_v24 = vpop.f32.mrb[0].mxu1 }
 0x113   :  { %v287_v25 = vadd.f32 %v286_v24, %v135_v22  ;;  %v881_v29 = vpop.f32.mrb[1].mxu1 }
 0x12a   :  { %v390_v30 = vpop.f32.mrb[2].mxu0 }
 0x12b   :  { %v391_v32 = vadd.f32 %v390_v30, %v287_v25  ;;  %v916_v35 = vpop.f32.mrb[3].mxu0 }
 0x132   :  { %v479_v36 = vpop.f32.mrb[2].mxu1 }
 0x133   :  { %v480_v42 = vadd.f32 %v479_v36, %v391_v32  ;;  %v951_v45 = vpop.f32.mrb[3].mxu1 }
 0x14a   :  { %v598_v48 = vpop.f32.mrb[4].mxu0 }
 0x14b   :  { %v599_v49 = vadd.f32 %v598_v48, %v480_v42  ;;  %v986_v52 = vpop.f32.mrb[5].mxu0 }
 0x152   :  { %v685_v0 = vpop.f32.mrb[4].mxu1 }
 0x153   :  { %v686_v57 = vadd.f32 %v685_v0, %v599_v49  ;;  %v1021_v58 = vpop.f32.mrb[5].mxu1 }
 0x155   :  { %v689_v61 = vadd.f32 %v686_v57, %v30_v55 }
 0x157   :  { %690 = vst [vmem:[#allocation2] sm:$0x7] %v689_v61 }
 0x15e   :  { %v694_v4 = vld [vmem:[#allocation2] sm:$0x7] }
 0x15f   :  { %v695_v9 = vmul.f32 %v694_v4, %v694_v4 }
 0x161   :  { %v697_v11 = vsel %vm696_vm1, %v695_v9, 0.0 }
 0x162   :  { %v698_v14 = vrot.slane %v697_v11, 4 }
 0x164   :  { %v699_v26 = vadd.f32 %v698_v14, %v697_v11 }
 0x166   :  { %v700_v27 = vrot.slane %v699_v26, 2 }
 0x168   :  { %v701_v37 = vadd.f32 %v700_v27, %v699_v26 }
 0x16a   :  { %v702_v38 = vrot.slane %v701_v37, 1 }
 0x16c   :  { %v703_v40 = vadd.f32 %v702_v38, %v701_v37 }
 0x16e   :  { %704 = vst [vmem:[%s1497_s2] sm:$0x1] %v703_v40 }
 0x16f   :  { %709 = vsyncpa [#allocation4], 1 }

</bundles_post_ra>
